<compile_context>
chip_gen: v7x
topology: tpu7x:2x2x1
jax: 0.10.0
libtpu: 0.0.40
codegen_flags: <defaults>
</compile_context>

<pallas_src>
import jax
import jax.numpy as jnp
from jax.experimental import pallas as pl
from jax.experimental.pallas import tpu as pltpu


def _attn_pool_kernel(x_ref, mbias_ref, w_ref, o_ref):
    """One batch tile.

    x_ref:     (Bt, S, D)  activation tile
    mbias_ref: (Bt, S)     additive f32 score bias: Linear bias at kept
                           positions, -1e9 at masked positions
    w_ref:     (1, D)      lane-dense Linear(dim, 1) weight row (f32)
    o_ref:     (Bt, D)     pooled output tile
    """
    x = x_ref[...]                                        # (Bt, S, D)
    w = w_ref[...]                                        # (1, D) f32

    # Scores on the VPU as a lane-dense (Bt, S) block.  (An (S,D)@(D,1) MXU
    # matvec uses 1/256 of the MXU output width and would dominate the tile's
    # HBM DMA time; the VPU multiply + lane reduce is ~10x fewer cycles.)
    s = jnp.sum(x * w, axis=-1) + mbias_ref[...]          # (Bt, S) f32

    # Numerically stable masked softmax over the sequence (lane) axis.
    m = jnp.max(s, axis=-1, keepdims=True)                # (Bt, 1)
    e = jnp.exp(s - m)                                    # (Bt, S)
    wt = e / jnp.sum(e, axis=-1, keepdims=True)           # exact reciprocal:
    # approx=True costs ~1e-3 relative error (and fails training-parity checks)

    # Weighted pool on the VPU: broadcast the weights over the lane (D) axis,
    # reduce over the sublane (S) axis.  Single unmasked full-width store.
    pooled = jnp.sum(wt[:, :, None] * x, axis=1)          # (Bt, D) f32
    o_ref[...] = pooled.astype(o_ref.dtype)


def _pick_block_batch(B, S, D, itemsize, *, target_bytes=8 << 20, pref_steps=8):
    """Rows per grid step.

    Constraints: bt divides B, and bt is sublane-aligned (multiple of 8) or
    equal to B, so the 2-D (bt, S) mask block and (bt, D) output block satisfy
    the (8,128) block-shape rule.  Prefers >= pref_steps grid steps (keeps both
    v7x TensorCores pipelined) while keeping per-step DMAs near target_bytes.
    """
    per_row = max(S * D * itemsize, 1)
    bt_cap = max(1, target_bytes // per_row)
    cands = [b for b in range(8, B + 1, 8) if B % b == 0 and b <= bt_cap]
    if not cands:
        return B                      # single full-array block: always legal
    stepped = [b for b in cands if (B // b) >= pref_steps]
    if stepped:
        return max(stepped)           # biggest tile that still gives long grid
    return min(cands)                 # otherwise maximize grid length


def attention_pooling(x, mask, weight, bias=None):
    """x: (B, S, D); mask: (B, S) (0 => padded); weight: (1, D); bias: (1,).

    Note: rows where every position is masked differ from PyTorch (reference
    gives a uniform softmax over -1e9 scores; here the additive mask cancels
    after max-subtraction) -- both are degenerate outputs.
    """
    B, S, D = x.shape
    itemsize = jnp.dtype(x.dtype).itemsize

    b0 = jnp.float32(0.0) if bias is None else jnp.asarray(bias, jnp.float32).reshape(())
    # Additive f32 score bias, lane-dense 2-D (no trailing dim of 1 -> no 128x
    # lane padding in VMEM):  masked -> -1e9, kept -> Linear bias.
    mbias = jnp.where(mask == 0, jnp.float32(-1e9), b0).astype(jnp.float32)   # (B, S)
    w_row = jnp.asarray(weight, jnp.float32).reshape(1, D)                    # lane-dense

    bt = _pick_block_batch(B, S, D, itemsize)
    grid = (B // bt,)

    # Per-step VMEM: double-buffered x / mask tiles, f32 elementwise
    # intermediates of the two VPU contractions, weight row, output tile.
    tile_x = bt * S * D * itemsize
    block_bytes = (2 * tile_x + 2 * bt * S * 4 + 2 * bt * S * D * 4
                   + D * 4 + 2 * bt * D * itemsize)
    try:
        vmem_cap = int(pltpu.get_tpu_info().vmem_capacity_bytes)
    except Exception:
        vmem_cap = 64 << 20           # conservative (v7x per-core)
    limit_cap = min(max(vmem_cap - (16 << 20), 32 << 20), 100 << 20)
    vmem_limit = int(min(max(32 << 20, 2 * block_bytes), limit_cap))

    cost = pl.CostEstimate(
        flops=4 * B * S * D,
        transcendentals=B * S,
        bytes_accessed=B * S * D * itemsize + 4 * B * S + B * D * itemsize + 4 * D,
    )

    # TODO(synk): for very long BigBird sequences (a single (1, S, D) row over
    # ~8-12 MiB, esp. on v7x's 64 MiB VMEM) add an S grid axis ("arbitrary")
    # with an online-softmax (Bt, D) accumulator instead of loading full rows.
    # TODO(synk): training use needs a jax.custom_vjp; this is forward-only.
    return pl.pallas_call(
        _attn_pool_kernel,
        out_shape=jax.ShapeDtypeStruct((B, D), x.dtype),
        grid_spec=pltpu.PrefetchScalarGridSpec(
            num_scalar_prefetch=0,
            grid=grid,
            in_specs=[
                pl.BlockSpec((bt, S, D), lambda i: (i, 0, 0)),
                pl.BlockSpec((bt, S), lambda i: (i, 0)),
                pl.BlockSpec((1, D), lambda i: (0, 0)),
            ],
            out_specs=pl.BlockSpec((bt, D), lambda i: (i, 0)),
        ),
        compiler_params=pltpu.CompilerParams(
            dimension_semantics=("parallel",),
            vmem_limit_bytes=vmem_limit),
        cost_estimate=cost,
    )(x, mbias, w_row)


def _reference(x, mask, weight, bias):
    scores = jnp.einsum("bsd,d->bs", x, weight[0]) + bias[0]
    scores = jnp.where(mask == 0, -1e9, scores)
    w = jax.nn.softmax(scores, axis=-1)[..., None]
    return jnp.sum(w * x, axis=1)


if __name__ == "__main__":
    B, S, D = 4, 8, 32
    key = jax.random.PRNGKey(0)
    kx, kw, kb, km = jax.random.split(key, 4)

    x = jax.random.normal(kx, (B, S, D), dtype=jnp.float32)
    # deterministic Linear(dim, 1) params (synthetic init, no checkpoint)
    weight = jax.random.normal(kw, (1, D), dtype=jnp.float32) * (1.0 / jnp.sqrt(D))
    bias = jax.random.normal(kb, (1,), dtype=jnp.float32) * 0.01
    # mask with some zeros (padding positions)
    mask = (jax.random.uniform(km, (B, S)) > 0.3).astype(jnp.int32)
    mask = mask.at[:, 0].set(1)  # ensure at least one valid token per row

    out = attention_pooling(x, mask, weight, bias)
    out = jax.block_until_ready(out)

    ref = _reference(x, mask, weight, bias)
    assert out.shape == (B, D)
    assert jnp.allclose(out, ref, atol=1e-3, rtol=1e-3), "mismatch vs reference"

    print("KERNEL_OK")
</pallas_src>

<mosaic_0001>
module attributes {stable_mosaic.version = 11 : i64} {
  func.func @_attn_pool_kernel(%arg0: i32, %arg1: memref<4x8x32xf32, #tpu.memory_space<vmem>>, %arg2: memref<4x8xf32, #tpu.memory_space<vmem>>, %arg3: memref<1x32xf32, #tpu.memory_space<vmem>>, %arg4: memref<4x32xf32, #tpu.memory_space<vmem>>) attributes {dimension_semantics = [#tpu.dimension_semantics<parallel>], iteration_bounds = array<i64: 1>, scalar_prefetch = 0 : i64, scratch_operands = 0 : i64, tpu.core_type = #tpu.core_type<tc>, window_params = [{transform_indices = @transform_0, window_bounds = array<i64: 4, 8, 32>}, {transform_indices = @transform_1, window_bounds = array<i64: 4, 8>}, {pipeline_mode = #tpu.pipeline_mode<synchronous>, transform_indices = @transform_2, window_bounds = array<i64: 1, 32>}, {transform_indices = @transform_3, window_bounds = array<i64: 4, 32>}]} {
    %c0 = arith.constant 0 : index
    %c0_0 = arith.constant 0 : index
    %c0_1 = arith.constant 0 : index
    %0 = vector.load %arg1[%c0, %c0_0, %c0_1] : memref<4x8x32xf32, #tpu.memory_space<vmem>>, vector<4x8x32xf32>
    %c0_2 = arith.constant 0 : index
    %c0_3 = arith.constant 0 : index
    %1 = vector.load %arg3[%c0_2, %c0_3] : memref<1x32xf32, #tpu.memory_space<vmem>>, vector<1x32xf32>
    %2 = vector.shape_cast %1 : vector<1x32xf32> to vector<1x1x32xf32>
    %3 = vector.broadcast %2 : vector<1x1x32xf32> to vector<4x8x32xf32>
    %4 = arith.mulf %0, %3 : vector<4x8x32xf32>
    %cst = arith.constant dense<0.000000e+00> : vector<4x8xf32>
    %5 = vector.multi_reduction <add>, %4, %cst [2] : vector<4x8x32xf32> to vector<4x8xf32>
    %c0_4 = arith.constant 0 : index
    %c0_5 = arith.constant 0 : index
    %6 = vector.load %arg2[%c0_4, %c0_5] : memref<4x8xf32, #tpu.memory_space<vmem>>, vector<4x8xf32>
    %7 = arith.addf %5, %6 : vector<4x8xf32>
    %cst_6 = arith.constant dense<0xFF800000> : vector<4xf32>
    %8 = vector.multi_reduction <maximumf>, %7, %cst_6 [1] : vector<4x8xf32> to vector<4xf32>
    %9 = vector.shape_cast %8 : vector<4xf32> to vector<4x1xf32>
    %10 = vector.broadcast %9 : vector<4x1xf32> to vector<4x8xf32>
    %11 = arith.subf %7, %10 : vector<4x8xf32>
    %12 = math.exp %11 : vector<4x8xf32>
    %cst_7 = arith.constant dense<0.000000e+00> : vector<4xf32>
    %13 = vector.multi_reduction <add>, %12, %cst_7 [1] : vector<4x8xf32> to vector<4xf32>
    %14 = vector.shape_cast %13 : vector<4xf32> to vector<4x1xf32>
    %15 = vector.broadcast %14 : vector<4x1xf32> to vector<4x8xf32>
    %16 = arith.divf %12, %15 : vector<4x8xf32>
    %17 = vector.shape_cast %16 : vector<4x8xf32> to vector<4x8x1xf32>
    %18 = vector.broadcast %17 : vector<4x8x1xf32> to vector<4x8x32xf32>
    %19 = arith.mulf %18, %0 : vector<4x8x32xf32>
    %cst_8 = arith.constant dense<0.000000e+00> : vector<4x32xf32>
    %20 = vector.multi_reduction <add>, %19, %cst_8 [1] : vector<4x8x32xf32> to vector<4x32xf32>
    %c0_9 = arith.constant 0 : index
    %c0_10 = arith.constant 0 : index
    %21 = vector.load %arg4[%c0_9, %c0_10] : memref<4x32xf32, #tpu.memory_space<vmem>>, vector<4x32xf32>
    tpu.vector_store %arg4[%c0_9, %c0_10], %20 {strides = array<i32>} : memref<4x32xf32, #tpu.memory_space<vmem>>, vector<4x32xf32>,
    return
  }
  func.func @transform_0(%arg0: i32) -> (i32, i32, i32) {
    %c0_i32 = arith.constant 0 : i32
    %c0_i32_0 = arith.constant 0 : i32
    %c0_i32_1 = arith.constant 0 : i32
    return %arg0, %c0_i32, %c0_i32_0 : i32, i32, i32
  }
  func.func @transform_1(%arg0: i32) -> (i32, i32) {
    %c0_i32 = arith.constant 0 : i32
    %c0_i32_0 = arith.constant 0 : i32
    return %arg0, %c0_i32 : i32, i32
  }
  func.func @transform_2(%arg0: i32) -> (i32, i32) {
    %c0_i32 = arith.constant 0 : i32
    %c0_i32_0 = arith.constant 0 : i32
    %c0_i32_1 = arith.constant 0 : i32
    return %c0_i32, %c0_i32_0 : i32, i32
  }
  func.func @transform_3(%arg0: i32) -> (i32, i32) {
    %c0_i32 = arith.constant 0 : i32
    %c0_i32_0 = arith.constant 0 : i32
    return %arg0, %c0_i32 : i32, i32
  }
}

</mosaic_0001>

<bundles_post_ra>
// kernel: tpu_custom_call.1
= control target key start
LH: loop header
LB: loop body
LE: loop exit
PB: predicated region body
PF: predicated region fallthrough
CT: control target
= control target key end

     0   :  { %8 = vsyncpa [#allocation3], 0  ;;  %s558_s0 = inlined_call_operand.hbm [shape: f32[4,8,32], index: 0, kind: input, shape index: {}]   ;;  %s559_s1 = inlined_call_operand.hbm [shape: f32[4,8], index: 1, kind: input, shape index: {}]   ;;  %s560_s2 = inlined_call_operand.vmem [shape: f32[1,32], index: 2, kind: input, shape index: {}]   ;;  %s561_s3 = inlined_call_operand.hbm [shape: f32[4,32], index: 3, kind: output, shape index: {}]  }
   0x1   :  { %9 = vsyncpa [#allocation6], 0 }
   0x2   :  { %10 = vsyncpa [#allocation4], 0  ;;  %s428_s12 = smov [#allocation2]   ;;  %s356_s16 = scalar_lea.hbm %s558_s0, 512 }
   0x3   :  { %s16_s13 = sshll.u32 %s428_s12, 4  ;;  %p357_p0 = scmp.ne.s32.totalorder %s558_s0, %s356_s16  ;;  %s17_s13 = int_to_ptr.vmem [resolvable:$true] %s16_s13 }
   0x4   :  { %p360_p1 = scmp.lt.u32.totalorder %s356_s16, %s558_s0 }
   0x6   :  { %p362_p2 = pnand %p360_p1, %p357_p0 }
   0x8   :  { %365 = shalt.err (!%p362_p2)
}
   0x9   :  { %s366_s21 = scalar_lea.vmem %s17_s13, 512  ;;  %p371_p4 = scmp.lt.s32.totalorder %s17_s13, %s17_s13 }
   0xa   :  { %p367_p3 = scmp.ne.s32.totalorder %s17_s13, %s366_s21  ;;  %p372_p5 = scmp.lt.s32.totalorder %s366_s21, %s366_s21 }
   0xc   :  { %p373_p6 = por %p372_p5, %p371_p4 }
   0xe   :  { %p374_p7 = pnand %p373_p6, %p367_p3 }
  0x10   :  { %377 = shalt.err (!%p374_p7)
}
  0x11   :  { %s429_s22 = smov 128   ;;  %s430_s23 = smov 8  }
  0x12   :  { %22 = dma.hbm_to_vmem [thread:$0]  %s558_s0, 512, %s17_s13, [#allocation3], %s429_s22, %s429_s22, %s430_s23  }
  0x13   :  { %s431_s26 = smov [#allocation5]   ;;  %s378_s30 = scalar_lea.hbm %s559_s1, 64 }
  0x14   :  { %s29_s27 = sshll.u32 %s431_s26, 4  ;;  %p379_p8 = scmp.ne.s32.totalorder %s559_s1, %s378_s30  ;;  %s30_s27 = int_to_ptr.vmem [resolvable:$true] %s29_s27 }
  0x15   :  { %p382_p9 = scmp.lt.u32.totalorder %s378_s30, %s559_s1 }
  0x17   :  { %p384_p10 = pnand %p382_p9, %p379_p8 }
  0x19   :  { %387 = shalt.err (!%p384_p10)
}
  0x1a   :  { %s388_s8 = scalar_lea.vmem %s30_s27, 64  ;;  %p393_p12 = scmp.lt.s32.totalorder %s30_s27, %s30_s27 }
  0x1b   :  { %p389_p11 = scmp.ne.s32.totalorder %s30_s27, %s388_s8  ;;  %p394_p13 = scmp.lt.s32.totalorder %s388_s8, %s388_s8 }
  0x1d   :  { %p395_p0 = por %p394_p13, %p393_p12 }
  0x1f   :  { %p396_p1 = pnand %p395_p0, %p389_p11 }
  0x21   :  { %399 = shalt.err (!%p396_p1)
}
  0x22   :  { %32 = dma.hbm_to_vmem [thread:$0]  %s559_s1, 64, %s30_s27, [#allocation6]  }
  0x23   :  { %422 = dma.done.wait [#allocation3], 512  }
  0x24   :  { %423 = vsyncadd [#allocation3], 4294966784 }
  0x25   :  { %424 = dma.done.wait [#allocation6], 64  }
  0x26   :  { %425 = vsyncadd [#allocation6], 4294967232  ;;  %v71_v0 = vlaneseq  ;;  %v480_v4 = vld [vmem:[#allocation2 + $0x10] sm:$0xff]  ;;  %v331_v5 = vld [vmem:[%s560_s2] ss:$0 sm:$0xff]  ;;  %vm56_vm0 = vcmask 261120  }
  0x27   :  { %v485_v6 = vld [vmem:[#allocation2] sm:$0xff]  ;;  %v54_v7 = vmul.f32 %v331_v5, %v480_v4  ;;  %v489_v9 = vld [vmem:[#allocation2 + $0x18] sm:$0xff]  ;;  %v491_v10 = vld [vmem:[#allocation2 + $0x8] sm:$0xff]  ;;  %v432_v25 = vmov 0   ;;  %vm141_vm1 = vcmask 1041409   ;;  %vm143_vm2 = vcmask 1042434  }
  0x28   :  { %v72_v1 = vshrl.u32 %v71_v0, 7  ;;  %v124_v2 = vand.u32 127, %v71_v0  ;;  %v52_v8 = vmul.f32 %v331_v5, %v485_v6  ;;  %v55_v11 = vmul.f32 %v331_v5, %v489_v9  ;;  %v69_v18 = vld [vmem:[#allocation5] sm:$0xf]  ;;  %339 = vset.pattern.permute.xlu1 %v432_v25  ;;  %338 = vset.pattern.permute.xlu0 %v432_v25  ;;  %s433_s1 = smov [#allocation7]  }
  0x29   :  { %v53_v12 = vmul.f32 %v331_v5, %v491_v10  ;;  %v63_v13 = vsel %vm56_vm0, %v54_v7, 0.0  ;;  %vm145_vm3 = vcmask 1043459   ;;  %vm148_vm4 = vcmask 60416   ;;  %s321_s2 = sshll.u32 %s433_s1, 4  ;;  %s322_s2 = int_to_ptr.vmem [resolvable:$true] %s321_s2 }
  0x2a   :  { %v478_v3 = vsub.s32 %v124_v2, %v72_v1  ;;  %v57_v14 = vsel %vm56_vm0, %v52_v8, 0.0  ;;  %64 = vadd.xlane.f32.xlu1 %v63_v13  ;;  %v66_v15 = vsel %vm56_vm0, %v55_v11, 0.0  ;;  %v499_v17 = vsub.s32 1, %v72_v1  ;;  %s400_s12 = scalar_lea.vmem %s322_s2, 64  ;;  %p405_p3 = scmp.lt.s32.totalorder %s322_s2, %s322_s2 }
  0x2b   :  { %58 = vadd.xlane.f32.xlu0 %v57_v14  ;;  %v60_v16 = vsel %vm56_vm0, %v53_v12, 0.0  ;;  %v502_v20 = vsub.s32 2, %v72_v1  ;;  %v504_v21 = vsub.s32 0, %v72_v1  ;;  %v507_v23 = vsub.s32 3, %v72_v1  ;;  %p401_p2 = scmp.ne.s32.totalorder %s322_s2, %s400_s12  ;;  %p406_p4 = scmp.lt.s32.totalorder %s400_s12, %s400_s12 }
  0x2c   :  { %v81_v19 = vrot.slane %v69_v18, %v499_v17  ;;  %vm313_vm5 = vcmask 257024  }
  0x2d   :  { %v88_v22 = vrot.slane %v69_v18, %v502_v20  ;;  %v74_v24 = vrot.slane %v69_v18, %v504_v21  ;;  %v95_v26 = vrot.slane %v69_v18, %v507_v23  ;;  %p407_p5 = por %p406_p4, %p405_p3 }
  0x2e   :  { %67 = vadd.xlane.f32.xlu1 %v66_v15 }
  0x2f   :  { %61 = vadd.xlane.f32.xlu0 %v60_v16  ;;  %p408_p6 = pnand %p407_p5, %p401_p2 }
  0x3f   :  { %83 = vbcast.lane.b32.xlu1 %v81_v19, 256 }
  0x43   :  { %90 = vbcast.lane.b32.xlu1 %v88_v22, 256 }
  0x45   :  { %76 = vbcast.lane.b32.xlu0 %v74_v24, 256 }
  0x47   :  { %97 = vbcast.lane.b32.xlu1 %v95_v26, 256 }
  0xb7   :  { %v65_v27 = vpop.xlane.xlu1 %64 }
  0xb8   :  { %v59_v28 = vpop.xlane.xlu0 %58 }
  0xbb   :  { %v68_v29 = vpop.xlane.xlu1 %67 }
  0xbc   :  { %v62_v30 = vpop.xlane.xlu0 %61 }
  0xbf   :  { %v84_v31 = vpop.permute.xlu1 %83 }
  0xc0   :  { %v77_v32 = vpop.permute.xlu0 %76  ;;  %v104_v33 = vadd.f32 %v84_v31, %v62_v30 }
  0xc1   :  { %v103_v34 = vadd.f32 %v77_v32, %v59_v28 }
  0xc2   :  { %115 = vperm.xlu1 %339, %v104_v33  }
  0xc3   :  { %112 = vperm.xlu0 %338, %v103_v34   ;;  %v91_v35 = vpop.permute.xlu1 %90 }
  0xc4   :  { %v105_v36 = vadd.f32 %v91_v35, %v65_v27 }
  0xc6   :  { %118 = vperm.xlu1 %339, %v105_v36  }
  0xc7   :  { %v98_v37 = vpop.permute.xlu1 %97 }
  0xc8   :  { %v106_v38 = vadd.f32 %v98_v37, %v68_v29 }
  0xca   :  { %121 = vperm.xlu0 %338, %v106_v38  }
 0x141   :  { %v116_v39 = vpop.permute.xlu1 %115 }
 0x142   :  { %v113_v40 = vpop.permute.xlu0 %112  ;;  %v132_v42 = vrot.slane %v116_v39, %v478_v3 }
 0x143   :  { %v128_v43 = vrot.slane %v113_v40, %v478_v3 }
 0x145   :  { %v119_v41 = vpop.permute.xlu1 %118  ;;  %v142_v46 = vsel %vm141_vm1, %v132_v42, %v128_v43 }
 0x146   :  { %v136_v44 = vrot.slane %v119_v41, %v478_v3 }
 0x148   :  { %v144_v48 = vsel %vm143_vm2, %v136_v44, %v142_v46 }
 0x149   :  { %v122_v45 = vpop.permute.xlu0 %121 }
 0x14a   :  { %v140_v47 = vrot.slane %v122_v45, %v478_v3 }
 0x14c   :  { %v146_v49 = vsel %vm145_vm3, %v140_v47, %v144_v48 }
 0x14d   :  { %v149_v50 = vsel %vm148_vm4, %v146_v49, -inf }
 0x14e   :  { %150 = vmax.xlane.f32.xlu1 %v149_v50 }
 0x1db   :  { %v151_v51 = vpop.xlane.xlu1 %150 }
 0x1dc   :  { %v156_v52 = vrot.slane %v151_v51, %v504_v21  ;;  %v160_v53 = vrot.slane %v151_v51, %v499_v17  ;;  %v164_v54 = vrot.slane %v151_v51, %v502_v20  ;;  %v168_v58 = vrot.slane %v151_v51, %v507_v23 }
 0x1de   :  { %v173_v55 = vsub.f32 %v103_v34, %v156_v52  ;;  %v174_v56 = vsub.f32 %v104_v33, %v160_v53  ;;  %v175_v59 = vsub.f32 %v105_v36, %v164_v54  ;;  %v176_v61 = vsub.f32 %v106_v38, %v168_v58 }
 0x1e0   :  { %v177_v57 = vmul.f32 1.442695, %v173_v55  ;;  %v179_v60 = vmul.f32 1.442695, %v174_v56  ;;  %v181_v62 = vmul.f32 1.442695, %v175_v59 }
 0x1e1   :  { %v183_v63 = vmul.f32 1.442695, %v176_v61 }
 0x1e2   :  { %340 = vpow2.f32 %v177_v57 }
 0x1e3   :  { %342 = vpow2.f32 %v179_v60 }
 0x1e4   :  { %344 = vpow2.f32 %v181_v62 }
 0x1e5   :  { %346 = vpow2.f32 %v183_v63 }
 0x1ec   :  { %v341_v0 = vpop.eup %340 }
 0x1ed   :  { %190 = vperm.xlu0 %338, %v341_v0   ;;  %v343_v1 = vpop.eup %342 }
 0x1ee   :  { %v345_v2 = vpop.eup %344 }
 0x1ef   :  { %v347_v5 = vpop.eup %346 }
 0x1f1   :  { %193 = vperm.xlu0 %338, %v343_v1  }
 0x1f5   :  { %196 = vperm.xlu0 %338, %v345_v2  }
 0x1f9   :  { %199 = vperm.xlu0 %338, %v347_v5  }
 0x26c   :  { %v191_v7 = vpop.permute.xlu0 %190 }
 0x26d   :  { %v204_v14 = vrot.slane %v191_v7, %v478_v3 }
 0x270   :  { %v194_v8 = vpop.permute.xlu0 %193 }
 0x271   :  { %v208_v12 = vrot.slane %v194_v8, %v478_v3 }
 0x273   :  { %v217_v16 = vsel %vm141_vm1, %v208_v12, %v204_v14 }
 0x274   :  { %v197_v11 = vpop.permute.xlu0 %196 }
 0x275   :  { %v212_v13 = vrot.slane %v197_v11, %v478_v3 }
 0x277   :  { %v218_v19 = vsel %vm143_vm2, %v212_v13, %v217_v16 }
 0x278   :  { %v200_v15 = vpop.permute.xlu0 %199 }
 0x279   :  { %v216_v18 = vrot.slane %v200_v15, %v478_v3 }
 0x27b   :  { %v219_v22 = vsel %vm145_vm3, %v216_v18, %v218_v19 }
 0x27c   :  { %v221_v24 = vsel %vm148_vm4, %v219_v22, 0.0 }
 0x27d   :  { %222 = vadd.xlane.f32.xlu0 %v221_v24 }
 0x30a   :  { %v223_v25 = vpop.xlane.xlu0 %222 }
 0x30b   :  { %v228_v26 = vrot.slane %v223_v25, %v504_v21  ;;  %v232_v27 = vrot.slane %v223_v25, %v499_v17  ;;  %v236_v28 = vrot.slane %v223_v25, %v502_v20  ;;  %v240_v29 = vrot.slane %v223_v25, %v507_v23 }
 0x30d   :  { %348 = vrcp.f32 %v228_v26 }
 0x30e   :  { %350 = vrcp.f32 %v232_v27 }
 0x30f   :  { %352 = vrcp.f32 %v236_v28 }
 0x310   :  { %354 = vrcp.f32 %v240_v29 }
 0x317   :  { %v349_v3 = vpop.eup %348 }
 0x318   :  { %v351_v30 = vpop.eup %350  ;;  %v246_v31 = vmul.f32 %v349_v3, %v341_v0 }
 0x319   :  { %v353_v32 = vpop.eup %352  ;;  %v248_v33 = vmul.f32 %v351_v30, %v343_v1 }
 0x31a   :  { %255 = vperm.xlu1 %339, %v246_v31   ;;  %v250_v34 = vmul.f32 %v353_v32, %v345_v2  ;;  %v355_v35 = vpop.eup %354 }
 0x31b   :  { %260 = vperm.xlu0 %338, %v248_v33   ;;  %v252_v21 = vmul.f32 %v355_v35, %v347_v5 }
 0x31e   :  { %265 = vperm.xlu1 %339, %v250_v34  }
 0x322   :  { %270 = vperm.xlu1 %339, %v252_v21  }
 0x399   :  { %v256_v17 = vpop.permute.xlu1 %255 }
 0x39a   :  { %v261_v20 = vpop.permute.xlu0 %260  ;;  %v273_v36 = vmul.f32 %v256_v17, %v485_v6 }
 0x39b   :  { %v274_v23 = vmul.f32 %v261_v20, %v491_v10 }
 0x39c   :  { %v277_v37 = vsel %vm56_vm0, %v273_v36, 0.0 }
 0x39d   :  { %v284_v38 = vsel %vm56_vm0, %v274_v23, 0.0  ;;  %v278_v39 = vrot.slane %v277_v37, 4  ;;  %v266_v40 = vpop.permute.xlu1 %265 }
 0x39e   :  { %v285_v41 = vrot.slane %v284_v38, 4  ;;  %v275_v42 = vmul.f32 %v266_v40, %v480_v4 }
 0x39f   :  { %v279_v43 = vadd.f32 %v278_v39, %v277_v37 }
 0x3a0   :  { %v286_v44 = vadd.f32 %v285_v41, %v284_v38  ;;  %v291_v45 = vsel %vm56_vm0, %v275_v42, 0.0 }
 0x3a1   :  { %v280_v46 = vrot.slane %v279_v43, 2  ;;  %v292_v47 = vrot.slane %v291_v45, 4  ;;  %v271_v48 = vpop.permute.xlu1 %270 }
 0x3a2   :  { %v287_v49 = vrot.slane %v286_v44, 2  ;;  %v276_v6 = vmul.f32 %v271_v48, %v489_v9 }
 0x3a3   :  { %v281_v10 = vadd.f32 %v280_v46, %v279_v43  ;;  %v293_v50 = vadd.f32 %v292_v47, %v291_v45 }
 0x3a4   :  { %v288_v51 = vadd.f32 %v287_v49, %v286_v44  ;;  %v298_v52 = vsel %vm56_vm0, %v276_v6, 0.0 }
 0x3a5   :  { %v294_v53 = vrot.slane %v293_v50, 2  ;;  %v299_v54 = vrot.slane %v298_v52, 4  ;;  %v282_v56 = vrot.slane %v281_v10, 1 }
 0x3a6   :  { %v289_v55 = vrot.slane %v288_v51, 1 }
 0x3a7   :  { %v295_v4 = vadd.f32 %v294_v53, %v293_v50  ;;  %v300_v57 = vadd.f32 %v299_v54, %v298_v52  ;;  %v283_v61 = vadd.f32 %v282_v56, %v281_v10 }
 0x3a8   :  { %v290_v60 = vadd.f32 %v289_v55, %v288_v51 }
 0x3a9   :  { %v296_v58 = vrot.slane %v295_v4, 1  ;;  %v301_v59 = vrot.slane %v300_v57, 2 }
 0x3aa   :  { %v309_v1 = vsel %vm141_vm1, %v290_v60, %v283_v61 }
 0x3ab   :  { %v302_v62 = vadd.f32 %v301_v59, %v300_v57  ;;  %v297_v63 = vadd.f32 %v296_v58, %v295_v4 }
 0x3ad   :  { %v303_v0 = vrot.slane %v302_v62, 1  ;;  %v310_v2 = vsel %vm143_vm2, %v297_v63, %v309_v1 }
 0x3af   :  { %v304_v9 = vadd.f32 %v303_v0, %v302_v62 }
 0x3b1   :  { %v311_v5 = vsel %vm145_vm3, %v304_v9, %v310_v2 }
 0x3b2   :  { %314 = vst.msk [vmem:[#allocation7] sm:$0xf] %vm313_vm5, %v311_v5 }
 0x3b3   :  { %411 = shalt.err (!%p408_p6)
}
 0x3b4   :  { %s412_s15 = scalar_lea.hbm %s561_s3, 64 }
 0x3b5   :  { %p413_p7 = scmp.ne.s32.totalorder %s561_s3, %s412_s15  ;;  %p416_p8 = scmp.lt.u32.totalorder %s412_s15, %s561_s3 }
 0x3b7   :  { %p418_p9 = pnand %p416_p8, %p413_p7 }
 0x3b9   :  { %421 = shalt.err (!%p418_p9)
}
 0x3ba   :  { %324 = dma.vmem_to_hbm [thread:$0]  %s322_s2, 64, %s561_s3, [#allocation4]  }
 0x3bb   :  { %426 = dma.done.wait [#allocation4], 64  }
 0x3bc   :  { %427 = vsyncadd [#allocation4], 4294967232 }
 0x3bd   :  { %328 = vsyncpa [#allocation3], 1 }
 0x3be   :  { %329 = vsyncpa [#allocation6], 1 }
 0x3bf   :  { %330 = vsyncpa [#allocation4], 1 }

</bundles_post_ra>
